<compile_context>
chip_gen: v7x
topology: tpu7x:2x2x1
jax: 0.10.0
libtpu: 0.0.40
codegen_flags: <defaults>
</compile_context>

<pallas_src>
import jax
import jax.numpy as jnp
from jax import lax
from jax.experimental import pallas as pl
from jax.experimental.pallas import tpu as pltpu


def score_kernel(x_ref, w1_ref, b1_ref, w2_ref, b2_ref, o_ref):
    # x_ref:  (tb, E)   input tile, native (batch, embed) layout
    # w1_ref: (H, E)    first Linear weight, PyTorch (out, in) layout
    # b1_ref: (H, 1)    first Linear bias (broadcast along lanes)
    # w2_ref: (H, 1)    second Linear weight (PyTorch (1, H), passed as a column)
    # b2_ref: (1,)      second Linear bias, scalar in SMEM
    # o_ref:  (1, tb)   lane-dense output tile (batch along lanes)

    # First linear on the MXU, contracting E on both operands:
    #   (H, E) x (tb, E) -> (H, tb), f32 accumulate.  The operand "transpose"
    # is an in-VMEM XLU vxpose (free slot here), not an HBM pass.
    h = lax.dot_general(
        w1_ref[...], x_ref[...],
        dimension_numbers=(((1,), (1,)), ((), ())),
        preferred_element_type=jnp.float32,
    )
    h = jnp.maximum(h + b1_ref[...], 0.0)  # bias broadcast along lanes + ReLU

    # Dropout(p=0.6) is identity in eval mode.
    # TODO(synk): training-mode dropout not implemented.

    # Second linear (H -> 1): VPU multiply + XLU sublane reduction, lands the
    # result lane-dense as (1, tb).
    o = jnp.sum(h * w2_ref[...], axis=0, keepdims=True)  # (1, tb)
    o_ref[...] = (o + b2_ref[0]).astype(o_ref.dtype)


def _round_up(v, m):
    return ((v + m - 1) // m) * m


def score_forward(x, w1, b1, w2, b2, *, max_single_tile=4096, tb_large=4096):
    """Forward pass of `score`.

    x:  (B, E)           -- f32 (or bf16; fed to the MXU as-is, f32 accumulate)
    w1: (H, E)           -- PyTorch nn.Linear(embed_dim, hidden_dim).weight
    b1: (H,)
    w2: (1, H)           -- PyTorch nn.Linear(hidden_dim, 1).weight
    b2: (1,)
    returns: (B, 1) in x.dtype
    """
    B, E = x.shape
    H = w1.shape[0]

    # Batch tiling:
    #  * B <= max_single_tile: one grid step (amortizes ~0.35 us/step overhead).
    #  * large B: lane-aligned tile (multiple of 256), capped so the parallel
    #    grid axis has >= ~4 steps (megacore sharding on v7x).
    if B <= max_single_tile:
        tb = B
        num_tiles = 1
    else:
        tb = min(tb_large, _round_up(pl.cdiv(B, 4), 256))
        tb = max(tb, 256)
        num_tiles = pl.cdiv(B, tb)
        # Trailing partial tile (if any) is handled by the grid: out-of-range
        # output lanes are masked on store, and the garbage rows read past B
        # only feed those discarded lanes.  No jnp.pad copy of x is made.

    b1c = jnp.reshape(b1, (H, 1)).astype(jnp.float32)
    w2c = jnp.reshape(w2, (H, 1)).astype(jnp.float32)
    b2s = jnp.reshape(jnp.asarray(b2, jnp.float32), (1,))

    out_row = pl.pallas_call(
        score_kernel,
        out_shape=jax.ShapeDtypeStruct((1, B), x.dtype),
        grid_spec=pltpu.PrefetchScalarGridSpec(
            num_scalar_prefetch=0,
            grid=(num_tiles,),
            in_specs=[
                pl.BlockSpec((tb, E), lambda i: (i, 0)),   # x row tile, native layout
                pl.BlockSpec((H, E), lambda i: (0, 0)),    # W1, VMEM-resident
                pl.BlockSpec((H, 1), lambda i: (0, 0)),    # b1, VMEM-resident
                pl.BlockSpec((H, 1), lambda i: (0, 0)),    # w2, VMEM-resident
                pl.BlockSpec(memory_space=pltpu.MemorySpace.SMEM),  # b2 scalar
            ],
            out_specs=pl.BlockSpec((1, tb), lambda i: (0, i)),  # lane-dense output
        ),
        compiler_params=pltpu.CompilerParams(
            dimension_semantics=("parallel",),
        ),
        cost_estimate=pl.CostEstimate(
            flops=2 * B * E * H + 2 * B * H,
            transcendentals=0,
            bytes_accessed=x.dtype.itemsize * B * E
            + 4 * (H * E + 2 * H + 1 + B),
        ),
    )(x, w1, b1c, w2c, b2s)

    # (1, B) row-major flattens in batch order -> (B, 1).
    return jnp.reshape(out_row, (B, 1))


if __name__ == "__main__":
    # Small shapes consistent with the module: batch=16, embed_dim=32, hidden_dim=64
    B, E, H = 16, 32, 64

    key = jax.random.PRNGKey(0)
    kx, kw1, kb1, kw2, kb2 = jax.random.split(key, 5)

    x = jax.random.normal(kx, (B, E), dtype=jnp.float32)
    # Deterministic parameter init (synthetic, not a checkpoint load),
    # stored in PyTorch nn.Linear layouts: weight = (out_features, in_features).
    w1 = jax.random.normal(kw1, (H, E), dtype=jnp.float32) * (1.0 / jnp.sqrt(E))
    b1 = jax.random.normal(kb1, (H,), dtype=jnp.float32) * 0.01
    w2 = jax.random.normal(kw2, (1, H), dtype=jnp.float32) * (1.0 / jnp.sqrt(H))
    b2 = jax.random.normal(kb2, (1,), dtype=jnp.float32) * 0.01

    out = score_forward(x, w1, b1, w2, b2)
    out = jax.block_until_ready(out)

    # Pure-JAX reference (dropout is identity in eval mode).
    ref = jnp.maximum(x @ w1.T + b1[None, :], 0.0) @ w2.T + b2[None, :]
    assert out.shape == (B, 1)
    assert jnp.allclose(out, ref, atol=1e-5, rtol=1e-5)

    print("KERNEL_OK")
</pallas_src>

<mosaic_0001>
module attributes {stable_mosaic.version = 11 : i64} {
  func.func @score_kernel(%arg0: i32, %arg1: memref<16x32xf32, #tpu.memory_space<vmem>>, %arg2: memref<64x32xf32, #tpu.memory_space<vmem>>, %arg3: memref<64x1xf32, #tpu.memory_space<vmem>>, %arg4: memref<64x1xf32, #tpu.memory_space<vmem>>, %arg5: memref<1xf32, #tpu.memory_space<smem>>, %arg6: memref<1x16xf32, #tpu.memory_space<vmem>>) attributes {dimension_semantics = [#tpu.dimension_semantics<parallel>], iteration_bounds = array<i64: 1>, scalar_prefetch = 0 : i64, scratch_operands = 0 : i64, tpu.core_type = #tpu.core_type<tc>, window_params = [{transform_indices = @transform_0, window_bounds = array<i64: 16, 32>}, {pipeline_mode = #tpu.pipeline_mode<synchronous>, transform_indices = @transform_1, window_bounds = array<i64: 64, 32>}, {pipeline_mode = #tpu.pipeline_mode<synchronous>, transform_indices = @transform_2, window_bounds = array<i64: 64, 1>}, {pipeline_mode = #tpu.pipeline_mode<synchronous>, transform_indices = @transform_3, window_bounds = array<i64: 64, 1>}, {transform_indices = @transform_4, window_bounds = array<i64: 1>}, {transform_indices = @transform_5, window_bounds = array<i64: 1, 16>}]} {
    %c0 = arith.constant 0 : index
    %c0_0 = arith.constant 0 : index
    %0 = vector.load %arg2[%c0, %c0_0] : memref<64x32xf32, #tpu.memory_space<vmem>>, vector<64x32xf32>
    %c0_1 = arith.constant 0 : index
    %c0_2 = arith.constant 0 : index
    %1 = vector.load %arg1[%c0_1, %c0_2] : memref<16x32xf32, #tpu.memory_space<vmem>>, vector<16x32xf32>
    %cst = arith.constant dense<0.000000e+00> : vector<64x16xf32>
    %2 = tpu.matmul %0, %1, %cst {dimension_numbers = #tpu.dot_dimension_numbers<[1], [1], [0], [0], [0, 0, 1, 0], [], []>} : vector<64x32xf32>, vector<16x32xf32>, vector<64x16xf32> -> vector<64x16xf32>
    %c0_3 = arith.constant 0 : index
    %c0_4 = arith.constant 0 : index
    %3 = vector.load %arg3[%c0_3, %c0_4] : memref<64x1xf32, #tpu.memory_space<vmem>>, vector<64x1xf32>
    %4 = vector.broadcast %3 : vector<64x1xf32> to vector<64x16xf32>
    %5 = arith.addf %2, %4 : vector<64x16xf32>
    %cst_5 = arith.constant 0.000000e+00 : f32
    %6 = vector.broadcast %cst_5 : f32 to vector<64x16xf32>
    %7 = arith.maximumf %5, %6 : vector<64x16xf32>
    %c0_6 = arith.constant 0 : index
    %c0_7 = arith.constant 0 : index
    %8 = vector.load %arg4[%c0_6, %c0_7] : memref<64x1xf32, #tpu.memory_space<vmem>>, vector<64x1xf32>
    %9 = vector.broadcast %8 : vector<64x1xf32> to vector<64x16xf32>
    %10 = arith.mulf %7, %9 : vector<64x16xf32>
    %cst_8 = arith.constant dense<0.000000e+00> : vector<16xf32>
    %11 = vector.multi_reduction <add>, %10, %cst_8 [0] : vector<64x16xf32> to vector<16xf32>
    %12 = vector.shape_cast %11 : vector<16xf32> to vector<1x16xf32>
    %c0_9 = arith.constant 0 : index
    %13 = memref.load %arg5[%c0_9] : memref<1xf32, #tpu.memory_space<smem>>
    %14 = vector.broadcast %13 : f32 to vector<1x16xf32>
    %15 = arith.addf %12, %14 : vector<1x16xf32>
    %c0_10 = arith.constant 0 : index
    %c0_11 = arith.constant 0 : index
    %16 = vector.load %arg6[%c0_10, %c0_11] : memref<1x16xf32, #tpu.memory_space<vmem>>, vector<1x16xf32>
    tpu.vector_store %arg6[%c0_10, %c0_11], %15 {strides = array<i32>} : memref<1x16xf32, #tpu.memory_space<vmem>>, vector<1x16xf32>,
    return
  }
  func.func @transform_0(%arg0: i32) -> (i32, i32) {
    %c0_i32 = arith.constant 0 : i32
    %c0_i32_0 = arith.constant 0 : i32
    return %arg0, %c0_i32 : i32, i32
  }
  func.func @transform_1(%arg0: i32) -> (i32, i32) {
    %c0_i32 = arith.constant 0 : i32
    %c0_i32_0 = arith.constant 0 : i32
    %c0_i32_1 = arith.constant 0 : i32
    return %c0_i32, %c0_i32_0 : i32, i32
  }
  func.func @transform_2(%arg0: i32) -> (i32, i32) {
    %c0_i32 = arith.constant 0 : i32
    %c0_i32_0 = arith.constant 0 : i32
    %c0_i32_1 = arith.constant 0 : i32
    return %c0_i32, %c0_i32_0 : i32, i32
  }
  func.func @transform_3(%arg0: i32) -> (i32, i32) {
    %c0_i32 = arith.constant 0 : i32
    %c0_i32_0 = arith.constant 0 : i32
    %c0_i32_1 = arith.constant 0 : i32
    return %c0_i32, %c0_i32_0 : i32, i32
  }
  func.func @transform_4(%arg0: i32) -> i32 {
    %c0_i32 = arith.constant 0 : i32
    %c0_i32_0 = arith.constant 0 : i32
    return %c0_i32 : i32
  }
  func.func @transform_5(%arg0: i32) -> (i32, i32) {
    %c0_i32 = arith.constant 0 : i32
    %c0_i32_0 = arith.constant 0 : i32
    return %c0_i32, %arg0 : i32, i32
  }
}

</mosaic_0001>

<bundles_post_ra>
// kernel: tpu_custom_call.1
= control target key start
LH: loop header
LB: loop body
LE: loop exit
PB: predicated region body
PF: predicated region fallthrough
CT: control target
= control target key end

     0   :  { %vm80_vm0 = vcmask 261120   ;;  %v393_v5 = vmov 0   ;;  %s536_s0 = inlined_call_operand.vmem [shape: f32[16,32], index: 0, kind: input, shape index: {}]   ;;  %s537_s1 = inlined_call_operand.vmem [shape: f32[64,32], index: 1, kind: input, shape index: {}]   ;;  %s538_s2 = inlined_call_operand.vmem [shape: f32[64,1], index: 2, kind: input, shape index: {}]   ;;  %s539_s3 = inlined_call_operand.vmem [shape: f32[64,1], index: 3, kind: input, shape index: {}]   ;;  %s540_s4 = inlined_call_operand.<no memory space> [shape: f32[1], index: 4, kind: input, shape index: {}]   ;;  %s541_s5 = inlined_call_operand.hbm [shape: f32[1,16], index: 5, kind: output, shape index: {}]  }
   0x1   :  { %v30_v0 = vld [vmem:[%s536_s0] sm:$0xff]  ;;  %v31_v1 = vld [vmem:[%s536_s0 + $0x8] sm:$0xff]  ;;  %vm358_vm1 = vmpackc.low %vm80_vm0, %vm80_vm0  ;;  %367 = vset.pattern.permute.xlu0 %v393_v5  ;;  %368 = vset.pattern.permute.xlu1 %v393_v5 }
   0x2   :  { %v22_v2 = vld [vmem:[%s537_s1] sm:$0xff]  ;;  %v357_v3 = vpack.c.bf16 %v31_v1, %v30_v0  ;;  %v34_v7 = vld [vmem:[%s538_s2 + $0x10] sm:$0xff]  ;;  %v33_v8 = vld [vmem:[%s538_s2 + $0x8] sm:$0xff] }
   0x3   :  { %345 = vmatprep.mubr.msk.f32.mxu0 %vm80_vm0, %v22_v2  ;;  %v26_v4 = vld [vmem:[%s537_s1 + $0x20] sm:$0xff]  ;;  %52 = vperm.xlu1 %368, %v34_v7   ;;  %v35_v9 = vld [vmem:[%s538_s2 + $0x18] sm:$0xff]  ;;  %v23_v10 = vld [vmem:[%s537_s1 + $0x8] sm:$0xff] }
   0x4   :  { %351 = vmatprep.mubr.msk.f32.mxu1 %vm80_vm0, %v26_v4  ;;  %359 = vmatprep.subr.msk.bf16.mxu0 %vm358_vm1, %v357_v3  ;;  %v32_v6 = vld [vmem:[%s538_s2] sm:$0xff]  ;;  %v27_v11 = vld [vmem:[%s537_s1 + $0x28] sm:$0xff]  ;;  %v24_v12 = vld [vmem:[%s537_s1 + $0x10] sm:$0xff] }
   0x5   :  { %363 = vmatprep.subr.msk.bf16.mxu1 %vm358_vm1, %v357_v3  ;;  %362 = vmatpush3.bf16.xpose.msk.msra.mxu0 %vm358_vm1, %v357_v3  ;;  %v28_v13 = vld [vmem:[%s537_s1 + $0x30] sm:$0xff] }
   0x6   :  { %364 = vmatpush3.bf16.xpose.msk.msra.mxu1 %vm358_vm1, %v357_v3  ;;  %42 = vperm.xlu0 %367, %v32_v6  }
   0x7   :  { %57 = vperm.xlu1 %368, %v35_v9  }
   0xa   :  { %47 = vperm.xlu0 %367, %v33_v8  }
   0xb   :  { %11 = vsyncpa [#allocation4], 0  ;;  %v224_v14 = vld [vmem:[%s539_s3] sm:$0xff]  ;;  %v225_v15 = vld [vmem:[%s539_s3 + $0x8] sm:$0xff]  ;;  %vm280_vm2 = vcmask 130048   ;;  %s394_s17 = smov [#allocation3]  }
   0xc   :  { %346 = vmatmul.mubr.msk.f32.vlgmr.msra.gmra.mrb[0].mxu0 %vm80_vm0, %v23_v10  ;;  %v25_v16 = vld [vmem:[%s537_s1 + $0x18] sm:$0xff]  ;;  %239 = vperm.xlu1 %368, %v225_v15   ;;  %v36_v18 = vld [vmem:[%s538_s2 + $0x20] sm:$0xff]  ;;  %v226_v19 = vld [vmem:[%s539_s3 + $0x10] sm:$0xff]  ;;  %s313_s18 = sshll.u32 %s394_s17, 4  ;;  %vm305_vm3 = vcmask 122880   ;;  %s314_s18 = int_to_ptr.vmem [resolvable:$true] %s313_s18 }
   0xd   :  { %352 = vmatmul.mubr.msk.f32.vlgmr.msra.gmra.mrb[0].mxu1 %vm80_vm0, %v27_v11  ;;  %348 = vmatprep.mubr.msk.f32.mxu0 %vm80_vm0, %v24_v12  ;;  %v29_v17 = vld [vmem:[%s537_s1 + $0x38] sm:$0xff]  ;;  %v37_v20 = vld [vmem:[%s538_s2 + $0x28] sm:$0xff]  ;;  %v38_v22 = vld [vmem:[%s538_s2 + $0x30] sm:$0xff]  ;;  %s369_s19 = scalar_lea.vmem %s314_s18, 16  ;;  %s373_s20 = scalar_lea.vmem %s314_s18, 32 }
   0xe   :  { %354 = vmatprep.mubr.msk.f32.mxu1 %vm80_vm0, %v28_v13  ;;  %234 = vperm.xlu0 %367, %v224_v14   ;;  %v227_v21 = vld [vmem:[%s539_s3 + $0x18] sm:$0xff]  ;;  %v228_v23 = vld [vmem:[%s539_s3 + $0x20] sm:$0xff]  ;;  %v229_v25 = vld [vmem:[%s539_s3 + $0x28] sm:$0xff]  ;;  %p370_p0 = scmp.ne.s32.totalorder %s314_s18, %s369_s19  ;;  %p374_p1 = scmp.lt.s32.totalorder %s314_s18, %s314_s18 }
   0xf   :  { %v39_v24 = vld [vmem:[%s538_s2 + $0x38] sm:$0xff]  ;;  %v230_v26 = vld [vmem:[%s539_s3 + $0x30] sm:$0xff]  ;;  %p375_p2 = scmp.lt.s32.totalorder %s373_s20, %s369_s19 }
  0x10   :  { %349 = vmatmul.mubr.msk.f32.gmra.mrb[2].mxu0 %vm80_vm0, %v25_v16  ;;  %244 = vperm.xlu1 %368, %v226_v19   ;;  %v231_v27 = vld [vmem:[%s539_s3 + $0x38] sm:$0xff] }
  0x11   :  { %355 = vmatmul.mubr.msk.f32.gmra.mrb[2].mxu1 %vm80_vm0, %v29_v17  ;;  %p376_p3 = por %p375_p2, %p374_p1 }
  0x12   :  { %62 = vperm.xlu0 %367, %v36_v18  }
  0x13   :  { %p377_p4 = pnand %p376_p3, %p370_p0 }
  0x14   :  { %249 = vperm.xlu1 %368, %v227_v21  }
  0x16   :  { %67 = vperm.xlu0 %367, %v37_v20  }
  0x18   :  { %254 = vperm.xlu1 %368, %v228_v23  }
  0x1a   :  { %72 = vperm.xlu0 %367, %v38_v22  }
  0x1c   :  { %259 = vperm.xlu1 %368, %v229_v25  }
  0x1e   :  { %77 = vperm.xlu0 %367, %v39_v24  }
  0x20   :  { %269 = vperm.xlu1 %368, %v231_v27  }
  0x22   :  { %264 = vperm.xlu0 %367, %v230_v26  }
  0x82   :  { %v53_v29 = vpop.permute.xlu1 %52 }
  0x85   :  { %v43_v28 = vpop.permute.xlu0 %42 }
  0x86   :  { %v58_v31 = vpop.permute.xlu1 %57 }
  0x89   :  { %v48_v30 = vpop.permute.xlu0 %47 }
  0x8b   :  { %v240_v33 = vpop.permute.xlu1 %239 }
  0x8d   :  { %v235_v32 = vpop.permute.xlu0 %234 }
  0x8f   :  { %v245_v35 = vpop.permute.xlu1 %244 }
  0x91   :  { %v63_v34 = vpop.permute.xlu0 %62 }
  0x93   :  { %v250_v37 = vpop.permute.xlu1 %249 }
  0x95   :  { %v68_v36 = vpop.permute.xlu0 %67 }
  0x97   :  { %v255_v45 = vpop.permute.xlu1 %254 }
  0x99   :  { %v73_v44 = vpop.permute.xlu0 %72 }
  0x9b   :  { %v260_v6 = vpop.permute.xlu1 %259 }
  0x9d   :  { %v78_v0 = vpop.permute.xlu0 %77 }
  0x9f   :  { %v270_v18 = vpop.permute.xlu1 %269 }
  0xa1   :  { %v265_v14 = vpop.permute.xlu0 %264 }
  0xdf   :  { %v347_v38 = vpop.f32.mrb[0].mxu0 }
  0xe0   :  { %v353_v39 = vpop.f32.mrb[0].mxu1  ;;  %v183_v40 = vadd.f32 %v347_v38, %v48_v30  ;;  %v177_v41 = vpop.f32.mrb[1].mxu0 }
  0xe1   :  { %v197_v42 = vpop.f32.mrb[1].mxu1  ;;  %v178_v43 = vadd.f32 %v177_v41, %v43_v28  ;;  %v203_v55 = vadd.f32 %v353_v39, %v68_v36 }
  0xe2   :  { %v217_v46 = vmax.f32 %v183_v40, 0.0  ;;  %v198_v48 = vadd.f32 %v197_v42, %v63_v34 }
  0xe3   :  { %v216_v47 = vmax.f32 %v178_v43, 0.0  ;;  %v350_v49 = vpop.f32.mrb[2].mxu0  ;;  %v221_v2 = vmax.f32 %v203_v55, 0.0 }
  0xe4   :  { %v356_v50 = vpop.f32.mrb[2].mxu1  ;;  %v273_v51 = vmul.f32 %v240_v33, %v217_v46  ;;  %v193_v52 = vadd.f32 %v350_v49, %v58_v31  ;;  %v187_v53 = vpop.f32.mrb[3].mxu0  ;;  %v220_v61 = vmax.f32 %v198_v48, 0.0 }
  0xe5   :  { %v207_v54 = vpop.f32.mrb[3].mxu1  ;;  %v272_v56 = vmul.f32 %v235_v32, %v216_v47  ;;  %v188_v57 = vadd.f32 %v187_v53, %v53_v29  ;;  %v213_v4 = vadd.f32 %v356_v50, %v78_v0  ;;  %v277_v11 = vmul.f32 %v260_v6, %v221_v2 }
  0xe6   :  { %v282_v58 = vsel %vm280_vm2, %v273_v51, 0.0  ;;  %v219_v59 = vmax.f32 %v193_v52, 0.0  ;;  %v208_v63 = vadd.f32 %v207_v54, %v73_v44  ;;  %v276_v7 = vmul.f32 %v255_v45, %v220_v61 }
  0xe7   :  { %v281_v60 = vsel %vm280_vm2, %v272_v56, 0.0  ;;  %v218_v62 = vmax.f32 %v188_v57, 0.0  ;;  %v223_v13 = vmax.f32 %v213_v4, 0.0  ;;  %v290_v20 = vsel %vm280_vm2, %v277_v11, 0.0 }
  0xe8   :  { %v283_v1 = vadd.f32 %v282_v58, %v281_v60  ;;  %v275_v3 = vmul.f32 %v250_v37, %v219_v59  ;;  %v222_v9 = vmax.f32 %v208_v63, 0.0  ;;  %v288_v16 = vsel %vm280_vm2, %v276_v7, 0.0 }
  0xe9   :  { %v274_v5 = vmul.f32 %v245_v35, %v218_v62  ;;  %v279_v21 = vmul.f32 %v270_v18, %v223_v13  ;;  %v303_v32 = vstv %s540_s4 }
  0xea   :  { %v286_v12 = vsel %vm280_vm2, %v275_v3, 0.0  ;;  %v278_v17 = vmul.f32 %v265_v14, %v222_v9 }
  0xeb   :  { %v284_v8 = vsel %vm280_vm2, %v274_v5, 0.0  ;;  %v294_v25 = vsel %vm280_vm2, %v279_v21, 0.0 }
  0xec   :  { %v285_v10 = vadd.f32 %v284_v8, %v283_v1  ;;  %v292_v23 = vsel %vm280_vm2, %v278_v17, 0.0 }
  0xee   :  { %v287_v15 = vadd.f32 %v286_v12, %v285_v10 }
  0xf0   :  { %v289_v19 = vadd.f32 %v288_v16, %v287_v15 }
  0xf2   :  { %v291_v22 = vadd.f32 %v290_v20, %v289_v19 }
  0xf4   :  { %v293_v24 = vadd.f32 %v292_v23, %v291_v22 }
  0xf6   :  { %v295_v26 = vadd.f32 %v294_v25, %v293_v24 }
  0xf8   :  { %v296_v27 = vrot.slane %v295_v26, 4 }
  0xfa   :  { %v297_v28 = vadd.f32 %v296_v27, %v295_v26 }
  0xfc   :  { %v298_v29 = vrot.slane %v297_v28, 2 }
  0xfe   :  { %v299_v30 = vadd.f32 %v298_v29, %v297_v28 }
 0x100   :  { %v300_v31 = vrot.slane %v299_v30, 1 }
 0x102   :  { %v301_v33 = vadd.f32 %v300_v31, %v299_v30 }
 0x104   :  { %v304_v34 = vadd.f32 %v303_v32, %v301_v33 }
 0x106   :  { %306 = vst.msk [vmem:[#allocation3] sm:$0x1] %vm305_vm3, %v304_v34 }
 0x107   :  { %380 = shalt.err (!%p377_p4)
}
 0x108   :  { %s381_s23 = scalar_lea.hbm %s541_s5, 16 }
 0x109   :  { %p382_p5 = scmp.ne.s32.totalorder %s541_s5, %s381_s23  ;;  %p385_p6 = scmp.lt.u32.totalorder %s381_s23, %s541_s5 }
 0x10b   :  { %p387_p7 = pnand %p385_p6, %p382_p5 }
 0x10d   :  { %390 = shalt.err (!%p387_p7)
}
 0x10e   :  { %316 = dma.vmem_to_hbm [thread:$0]  %s314_s18, 16, %s541_s5, [#allocation4]  }
 0x10f   :  { %391 = dma.done.wait [#allocation4], 16  }
 0x110   :  { %392 = vsyncadd [#allocation4], 4294967280 }
 0x111   :  { %320 = vsyncpa [#allocation4], 1 }

</bundles_post_ra>
